<compile_context>
chip_gen: v7x
topology: tpu7x:2x2x1
jax: 0.10.0
libtpu: 0.0.40
codegen_flags: <defaults>
</compile_context>

<pallas_src>
import jax
import jax.numpy as jnp
from jax.experimental import pallas as pl
from jax.experimental.pallas import tpu as pltpu


def _round_up(n, m):
    return ((n + m - 1) // m) * m


def decoder_kernel(x_ref, w1_ref, b1_ref, w2_ref, b2_ref, o_ref, h_ref):
    # fc_1 + ReLU: compute once per row block (first column tile), keep the
    # activation resident in VMEM scratch for the remaining column tiles.
    @pl.when(pl.program_id(1) == 0)
    def _():
        h = jnp.dot(x_ref[...], w1_ref[...], preferred_element_type=jnp.float32)
        h = jnp.maximum(h + b1_ref[...], 0.0)
        h_ref[...] = h.astype(h_ref.dtype)

    # fc_2 on the current output-column tile (MXU bf16, f32 accumulate).
    y = jnp.dot(h_ref[...], w2_ref[...], preferred_element_type=jnp.float32)
    o_ref[...] = (y + b2_ref[...]).astype(o_ref.dtype)


def _pick_tiles(batch, out_features):
    # Row tile: multiple of 16 (bf16 sublane packing), capped at 128 rows.
    tm = 128 if batch >= 128 else _round_up(max(batch, 1), 16)
    # Column tile: lane-dense multiple of 128 that divides out_features, <= 512
    # (full width if the output is small or not 128-aligned).
    if out_features <= 512 or out_features % 128 != 0:
        tn = out_features
    else:
        tn = 512
        while out_features % tn != 0:
            tn -= 128
    return tm, tn


def decoder_forward(x, w1, b1, w2, b2, out_size):
    """x: (B, bneck); weights stored (in_features, out_features).
    Returns (B, 3, out_size), matching the PyTorch forward."""
    B, bneck = x.shape
    hidden = w1.shape[1]
    out_features = w2.shape[1]
    assert out_features == 3 * out_size

    tm, tn = _pick_tiles(B, out_features)
    b_pad = _round_up(B, tm)

    # bf16 weights/activations on the memory-bound path; f32 biases + accumulate.
    x_bf = x.astype(jnp.bfloat16)
    if b_pad != B:
        x_bf = jnp.pad(x_bf, ((0, b_pad - B), (0, 0)))
    w1_bf = w1.astype(jnp.bfloat16)
    w2_bf = w2.astype(jnp.bfloat16)
    b1_f32 = b1.astype(jnp.float32).reshape(1, hidden)
    b2_f32 = b2.astype(jnp.float32).reshape(1, out_features)

    grid = (b_pad // tm, out_features // tn)

    # Double-buffered tile footprint (+ resident W1/b1, h scratch) with headroom.
    vmem_bytes = (
        2 * tm * bneck * 2          # x tiles (bf16)
        + 2 * bneck * hidden * 2    # W1 (resident, counted conservatively x2)
        + 2 * hidden * 4            # b1
        + 2 * hidden * tn * 2       # W2 tiles (bf16)
        + 2 * tn * 4                # b2 tiles
        + 2 * tm * tn * 4           # output tiles (f32)
        + tm * hidden * 2           # h scratch (bf16)
    )
    vmem_limit = min(vmem_bytes + (8 << 20), 64 << 20)

    cost = pl.CostEstimate(
        flops=2 * B * (bneck * hidden + hidden * out_features),
        transcendentals=0,
        bytes_accessed=(x_bf.size * 2 + w1_bf.size * 2 + w2_bf.size * 2
                        + b1_f32.size * 4 + b2_f32.size * 4
                        + b_pad * out_features * 4),
    )

    flat = pl.pallas_call(
        decoder_kernel,
        out_shape=jax.ShapeDtypeStruct((b_pad, out_features), jnp.float32),
        grid_spec=pltpu.PrefetchScalarGridSpec(
            num_scalar_prefetch=0,
            grid=grid,
            in_specs=[
                pl.BlockSpec((tm, bneck), lambda i, j: (i, 0)),       # x row tile
                pl.BlockSpec((bneck, hidden), lambda i, j: (0, 0)),   # W1 resident
                pl.BlockSpec((1, hidden), lambda i, j: (0, 0)),       # b1 resident
                pl.BlockSpec((hidden, tn), lambda i, j: (0, j)),      # W2 col tile
                pl.BlockSpec((1, tn), lambda i, j: (0, j)),           # b2 col tile
            ],
            out_specs=pl.BlockSpec((tm, tn), lambda i, j: (i, j)),
            scratch_shapes=[pltpu.VMEM((tm, hidden), jnp.bfloat16)],  # fc_1 act
        ),
        compiler_params=pltpu.CompilerParams(
            dimension_semantics=("parallel", "arbitrary"),
            vmem_limit_bytes=vmem_limit,
        ),
        cost_estimate=cost,
    )(x_bf, w1_bf, b1_f32, w2_bf, b2_f32)

    # x.view(B, 3, out_size) in PyTorch == row-major reshape (drop batch padding).
    return flat[:B].reshape(B, 3, out_size)


def init_params(key, bneck, hidden, out_size, dtype=jnp.float32):
    """Deterministic synthetic parameters (shapes from Decoder.__init__),
    stored transposed as (in_features, out_features)."""
    k1, k2, k3, k4 = jax.random.split(key, 4)
    out_features = 3 * out_size
    s1 = 1.0 / jnp.sqrt(bneck)
    s2 = 1.0 / jnp.sqrt(hidden)
    w1 = jax.random.uniform(k1, (bneck, hidden), dtype, -s1, s1)
    b1 = jax.random.uniform(k2, (1, hidden), dtype, -s1, s1)
    w2 = jax.random.uniform(k3, (hidden, out_features), dtype, -s2, s2)
    b2 = jax.random.uniform(k4, (1, out_features), dtype, -s2, s2)
    return w1, b1, w2, b2


if __name__ == "__main__":
    # Small shapes consistent with the module (real defaults: 128/1024/2048).
    B = 4           # batch (not a multiple of the row tile -> exercises padding)
    BNECK = 128     # bneck_size (module default)
    HIDDEN = 256    # layer_sizes[1]
    OUT_SIZE = 256  # layer_sizes[2] // 3  -> out_features = 768 (2 column tiles)

    key = jax.random.PRNGKey(0)
    kx, kp = jax.random.split(key)
    x = jax.random.normal(kx, (B, BNECK), jnp.float32)
    w1, b1, w2, b2 = init_params(kp, BNECK, HIDDEN, OUT_SIZE)

    out = decoder_forward(x, w1, b1, w2, b2, OUT_SIZE)
    out = jax.block_until_ready(out)

    # Pure-JAX reference with the same dtype chain (bf16 weights/activations,
    # f32 accumulation and bias adds).
    xb, w1b, w2b = (t.astype(jnp.bfloat16) for t in (x, w1, w2))
    h_ref = jnp.maximum(jnp.dot(xb, w1b, preferred_element_type=jnp.float32) + b1, 0.0)
    h_ref = h_ref.astype(jnp.bfloat16)
    ref = (jnp.dot(h_ref, w2b, preferred_element_type=jnp.float32) + b2)
    ref = ref.reshape(B, 3, OUT_SIZE)

    assert out.shape == (B, 3, OUT_SIZE)
    assert jnp.allclose(out, ref, atol=2e-2, rtol=2e-2), float(jnp.max(jnp.abs(out - ref)))

    print("KERNEL_OK")
</pallas_src>

<mosaic_0001>
module attributes {stable_mosaic.version = 11 : i64} {
  func.func @decoder_kernel(%arg0: i32, %arg1: i32, %arg2: memref<16x128xbf16, #tpu.memory_space<vmem>>, %arg3: memref<128x256xbf16, #tpu.memory_space<vmem>>, %arg4: memref<1x256xf32, #tpu.memory_space<vmem>>, %arg5: memref<256x384xbf16, #tpu.memory_space<vmem>>, %arg6: memref<1x384xf32, #tpu.memory_space<vmem>>, %arg7: memref<16x384xf32, #tpu.memory_space<vmem>>, %arg8: memref<16x256xbf16, #tpu.memory_space<vmem>>) attributes {dimension_semantics = [#tpu.dimension_semantics<parallel>, #tpu.dimension_semantics<arbitrary>], iteration_bounds = array<i64: 1, 2>, scalar_prefetch = 0 : i64, scratch_operands = 1 : i64, tpu.core_type = #tpu.core_type<tc>, window_params = [{transform_indices = @transform_0, window_bounds = array<i64: 16, 128>}, {pipeline_mode = #tpu.pipeline_mode<synchronous>, transform_indices = @transform_1, window_bounds = array<i64: 128, 256>}, {pipeline_mode = #tpu.pipeline_mode<synchronous>, transform_indices = @transform_2, window_bounds = array<i64: 1, 256>}, {transform_indices = @transform_3, window_bounds = array<i64: 256, 384>}, {transform_indices = @transform_4, window_bounds = array<i64: 1, 384>}, {transform_indices = @transform_5, window_bounds = array<i64: 16, 384>}]} {
    %c0_i32 = arith.constant 0 : i32
    %0 = arith.cmpi eq, %arg1, %c0_i32 : i32
    %1 = arith.extui %0 : i1 to i32
    %c0_i32_0 = arith.constant 0 : i32
    %2 = arith.cmpi ne, %1, %c0_i32_0 : i32
    scf.if %2 {
      %c0_8 = arith.constant 0 : index
      %c0_9 = arith.constant 0 : index
      %10 = vector.load %arg2[%c0_8, %c0_9] : memref<16x128xbf16, #tpu.memory_space<vmem>>, vector<16x128xbf16>
      %c0_10 = arith.constant 0 : index
      %c0_11 = arith.constant 0 : index
      %11 = vector.load %arg3[%c0_10, %c0_11] : memref<128x256xbf16, #tpu.memory_space<vmem>>, vector<128x256xbf16>
      %cst_12 = arith.constant dense<0.000000e+00> : vector<16x256xf32>
      %12 = tpu.matmul %10, %11, %cst_12 {dimension_numbers = #tpu.dot_dimension_numbers<[1], [0], [0], [1], [0, 0, 1, 1], [], []>} : vector<16x128xbf16>, vector<128x256xbf16>, vector<16x256xf32> -> vector<16x256xf32>
      %c0_13 = arith.constant 0 : index
      %c0_14 = arith.constant 0 : index
      %13 = vector.load %arg4[%c0_13, %c0_14] : memref<1x256xf32, #tpu.memory_space<vmem>>, vector<1x256xf32>
      %14 = vector.broadcast %13 : vector<1x256xf32> to vector<16x256xf32>
      %15 = arith.addf %12, %14 : vector<16x256xf32>
      %cst_15 = arith.constant 0.000000e+00 : f32
      %16 = vector.broadcast %cst_15 : f32 to vector<16x256xf32>
      %17 = arith.maximumf %15, %16 : vector<16x256xf32>
      %18 = arith.truncf %17 : vector<16x256xf32> to vector<16x256xbf16>
      %c0_16 = arith.constant 0 : index
      %c0_17 = arith.constant 0 : index
      %19 = vector.load %arg8[%c0_16, %c0_17] : memref<16x256xbf16, #tpu.memory_space<vmem>>, vector<16x256xbf16>
      tpu.vector_store %arg8[%c0_16, %c0_17], %18 {strides = array<i32>} : memref<16x256xbf16, #tpu.memory_space<vmem>>, vector<16x256xbf16>,
    } else {
    }
    %c0 = arith.constant 0 : index
    %c0_1 = arith.constant 0 : index
    %3 = vector.load %arg8[%c0, %c0_1] : memref<16x256xbf16, #tpu.memory_space<vmem>>, vector<16x256xbf16>
    %c0_2 = arith.constant 0 : index
    %c0_3 = arith.constant 0 : index
    %4 = vector.load %arg5[%c0_2, %c0_3] : memref<256x384xbf16, #tpu.memory_space<vmem>>, vector<256x384xbf16>
    %cst = arith.constant dense<0.000000e+00> : vector<16x384xf32>
    %5 = tpu.matmul %3, %4, %cst {dimension_numbers = #tpu.dot_dimension_numbers<[1], [0], [0], [1], [0, 0, 1, 1], [], []>} : vector<16x256xbf16>, vector<256x384xbf16>, vector<16x384xf32> -> vector<16x384xf32>
    %c0_4 = arith.constant 0 : index
    %c0_5 = arith.constant 0 : index
    %6 = vector.load %arg6[%c0_4, %c0_5] : memref<1x384xf32, #tpu.memory_space<vmem>>, vector<1x384xf32>
    %7 = vector.broadcast %6 : vector<1x384xf32> to vector<16x384xf32>
    %8 = arith.addf %5, %7 : vector<16x384xf32>
    %c0_6 = arith.constant 0 : index
    %c0_7 = arith.constant 0 : index
    %9 = vector.load %arg7[%c0_6, %c0_7] : memref<16x384xf32, #tpu.memory_space<vmem>>, vector<16x384xf32>
    tpu.vector_store %arg7[%c0_6, %c0_7], %8 {strides = array<i32>} : memref<16x384xf32, #tpu.memory_space<vmem>>, vector<16x384xf32>,
    return
  }
  func.func @transform_0(%arg0: i32, %arg1: i32) -> (i32, i32) {
    %c0_i32 = arith.constant 0 : i32
    %c0_i32_0 = arith.constant 0 : i32
    return %arg0, %c0_i32 : i32, i32
  }
  func.func @transform_1(%arg0: i32, %arg1: i32) -> (i32, i32) {
    %c0_i32 = arith.constant 0 : i32
    %c0_i32_0 = arith.constant 0 : i32
    %c0_i32_1 = arith.constant 0 : i32
    return %c0_i32, %c0_i32_0 : i32, i32
  }
  func.func @transform_2(%arg0: i32, %arg1: i32) -> (i32, i32) {
    %c0_i32 = arith.constant 0 : i32
    %c0_i32_0 = arith.constant 0 : i32
    %c0_i32_1 = arith.constant 0 : i32
    return %c0_i32, %c0_i32_0 : i32, i32
  }
  func.func @transform_3(%arg0: i32, %arg1: i32) -> (i32, i32) {
    %c0_i32 = arith.constant 0 : i32
    %c0_i32_0 = arith.constant 0 : i32
    return %c0_i32, %arg1 : i32, i32
  }
  func.func @transform_4(%arg0: i32, %arg1: i32) -> (i32, i32) {
    %c0_i32 = arith.constant 0 : i32
    %c0_i32_0 = arith.constant 0 : i32
    return %c0_i32, %arg1 : i32, i32
  }
  func.func @transform_5(%arg0: i32, %arg1: i32) -> (i32, i32) {
    %c0_i32 = arith.constant 0 : i32
    return %arg0, %arg1 : i32, i32
  }
}

</mosaic_0001>

<bundles_post_ra>
// kernel: tpu_custom_call.1
= control target key start
LH: loop header
LB: loop body
LE: loop exit
PB: predicated region body
PF: predicated region fallthrough
CT: control target
= control target key end

     0   :  { %10 = vsyncpa [#allocation4], 0  ;;  %s1895_s0 = inlined_call_operand.hbm [shape: bf16[16,128], index: 0, kind: input, shape index: {}]   ;;  %s1896_s1 = inlined_call_operand.hbm [shape: bf16[128,256], index: 1, kind: input, shape index: {}]   ;;  %s1897_s2 = inlined_call_operand.vmem [shape: f32[1,256], index: 2, kind: input, shape index: {}]   ;;  %s1898_s3 = inlined_call_operand.hbm [shape: bf16[256,768], index: 3, kind: input, shape index: {}]   ;;  %s1899_s4 = inlined_call_operand.vmem [shape: f32[1,768], index: 4, kind: input, shape index: {}]   ;;  %s1900_s5 = inlined_call_operand.hbm [shape: f32[16,768], index: 5, kind: output, shape index: {}]  }
   0x1   :  { %11 = vsyncpa [#allocation7], 0 }
   0x2   :  { %12 = vsyncpa [#allocation5], 0 }
   0x3   :  { %14 = vsyncpa [#allocation5 + $0x1], 0  ;;  %s1559_s18 = smov 0   ;;  %s1561_s19 = smov 0  }
   0x4   :  { %s1563_s20 = smov 0   ;;  %s1565_s21 = smov 0  }
   0x5   :  { %s1567_s22 = smov 0   ;;  %s1569_s23 = smov 0  }
   0x6 LB: > { %s1590_s24 = sadd.s32 4294967295, %s1512_s23   ;;  %s1048_s25 = sadd.s32 4294967294, %s1512_s23   ;;  %s1512_s23 = sphi %s1569_s23, %s20_s23   ;;  %s1508_s22 = sphi %s1567_s22, %s1927_s22   ;;  %s1504_s21 = sphi %s1565_s21, %s1926_s21   ;;  %s1500_s20 = sphi %s1563_s20, %s1925_s20   ;;  %s1496_s19 = sphi %s1561_s19, %s1924_s19   ;;  %s1492_s18 = sphi %s1559_s18, %s1923_s18  }
   0x7   : > { %p114_p0 = scmp.ne.s32.totalorder %s1500_s20, %s1496_s19  ;;  %p115_p1 = scmp.eq.s32.totalorder %s1512_s23, 0 }
   0x8   : > { %p120_p2 = scmp.ne.s32.totalorder %s1496_s19, %s1492_s18  ;;  %p1901_p3 = scmp.eq.s32.totalorder %s1590_s24, 0 }
   0x9   : > { %p172_p4 = scmp.eq.s32.totalorder %s1590_s24, 1  ;;  %p1601_p5 = por %p115_p1, %p114_p0 }
   0xa   : > { %p178_p6 = scmp.eq.s32.totalorder %s1048_s25, 1  ;;  %p1607_p7 = por %p1901_p3, %p120_p2 }
   0xb   : > { %p1611_p8 = por %p172_p4, %p114_p0  ;;  %p1049_p10 = scmp.ge.s32.totalorder %s1512_s23, 1 }
   0xc   : > { %s1906_s28 = scalar_select %p1607_p7, 1, 0 }
   0xd   : > { %s1907_s29 = scalar_select %p1611_p8, 1, 0 }
   0xe   : > { %p1615_p9 = por %p178_p6, %p120_p2  ;;  %p185_p11 = scmp.lt.s32.totalorder %s1512_s23, 3 }
   0xf   : > { %s1514_s7 = smov [#allocation3]   ;;  %p1182_p1 = scmp.lt.s32.totalorder %s1512_s23, 2 }
  0x10   : > { %s1908_s30 = scalar_select %p1615_p9, 1, 0 }
  0x11   : > { %p1621_p12 = pnand %p1049_p10, %p185_p11  ;;  %s200_s8 = sshll.u32 %s1514_s7, 4  ;;  %s1625_s8 = int_to_ptr.vmem [resolvable:$true] %s200_s8 }
  0x12   : > { %1909 = sst [smem:[#allocation14_spill]] %s1908_s30  ;;  %s1515_s10 = smov [#allocation6]  }
  0x13   : > { %p1165_p13 = pneg %p1621_p12  ;;  %s213_s11 = sshll.u32 %s1515_s10, 4  ;;  %s1643_s11 = int_to_ptr.vmem [resolvable:$true] %s213_s11 }
  0x14   : > { %p1639_p4 = pnand %p1182_p1, %p1601_p5  ;;  %s1336_s15 = scalar_lea.hbm %s1895_s0, 128 }
  0x15   : > { %p1633_p2 = pnand %p1165_p13, %p1901_p3  ;;  %p1337_p6 = scmp.ne.s32.totalorder %s1895_s0, %s1336_s15 }
  0x16   : > { %p1343_p5 = scmp.lt.u32.totalorder %s1336_s15, %s1895_s0 }
  0x17   : > { %p1338_p10 = pneg %p1633_p2 }
  0x19   : > { %p1339_p11 = pnand %p1338_p10, %p1337_p6 }
  0x1b   : > { %p1340_p13 = pneg %p1339_p11 }
  0x1d   : > { %p1345_p1 = pnand %p1343_p5, %p1340_p13 }
  0x1f   : > { %1348 = shalt.err (!%p1345_p1)
}
  0x20   : > { %s1349_s7 = scalar_lea.vmem %s1625_s8, 128  ;;  %p1357_p8 = scmp.lt.s32.totalorder %s1625_s8, %s1625_s8 }
  0x21   : > { %p1350_p0 = scmp.ne.s32.totalorder %s1625_s8, %s1349_s7  ;;  %p1358_p6 = scmp.lt.s32.totalorder %s1349_s7, %s1349_s7 }
  0x23   : > { %p1352_p3 = pnand %p1350_p0, %p1338_p10  ;;  %p1359_p11 = por %p1358_p6, %p1357_p8 }
  0x25   : > { %p1353_p9 = pneg %p1352_p3 }
  0x27   : > { %p1360_p7 = pnand %p1359_p11, %p1353_p9 }
  0x29   : > { %1363 = shalt.err (!%p1360_p7)
}
  0x2a   : > { %s1516_s10 = smov 64   ;;  %s1517_s13 = smov 4  }
  0x2b   : > { %1168 = dma.hbm_to_vmem [thread:$0]  (!%p1633_p2), %s1895_s0, 128, %s1625_s8, [#allocation4], %s1516_s10, %s1516_s10, %s1517_s13  }
  0x2c   : > { %s1364_s25 = scalar_lea.hbm %s1896_s1, 2048 }
  0x2d   : > { %p1365_p3 = scmp.ne.s32.totalorder %s1896_s1, %s1364_s25  ;;  %p1371_p9 = scmp.lt.u32.totalorder %s1364_s25, %s1896_s1 }
  0x2f   : > { %p1367_p7 = pnand %p1365_p3, %p1338_p10 }
  0x31   : > { %p1368_p8 = pneg %p1367_p7 }
  0x33   : > { %p1373_p0 = pnand %p1371_p9, %p1368_p8 }
  0x35   : > { %1376 = shalt.err (!%p1373_p0)
}
  0x36   : > { %s1377_s8 = scalar_lea.vmem %s1643_s11, 2048  ;;  %p1385_p6 = scmp.lt.s32.totalorder %s1643_s11, %s1643_s11 }
  0x37   : > { %p1378_p13 = scmp.ne.s32.totalorder %s1643_s11, %s1377_s8  ;;  %p1386_p11 = scmp.lt.s32.totalorder %s1377_s8, %s1377_s8 }
  0x39   : > { %p1380_p5 = pnand %p1378_p13, %p1338_p10  ;;  %p1387_p3 = por %p1386_p11, %p1385_p6 }
  0x3b   : > { %p1381_p1 = pneg %p1380_p5 }
  0x3d   : > { %p1388_p7 = pnand %p1387_p3, %p1381_p1 }
  0x3f   : > { %1391 = shalt.err (!%p1388_p7)
}
  0x40   : > { %s1518_s26 = smov 128   ;;  %s1519_s30 = smov 8  }
  0x41   : > { %1171 = dma.hbm_to_vmem [thread:$0]  (!%p1633_p2), %s1896_s1, 2048, %s1643_s11, [#allocation7], %s1518_s26, %s1518_s26, %s1519_s30  }
  0x42   : > { %s230_s14 = sand.u32 1, %s1512_s23   ;;  %s29_s15 = sadd.s32 1, %s1508_s22 }
  0x43   : > { %s232_s16 = sand.u32 1, %s1500_s20   ;;  %p30_p10 = scmp.ge.s32.totalorder %s29_s15, 2 }
  0x44   : > { %s1150_s17 = smul.u32 384, %s232_s16  ;;  %s1913_s30 = sadd.s32 1, %s1500_s20 }
  0x45   : > { %s1126_s25 = smul.u32 192, %s1508_s22  ;;  %s1929_s15 = smov (%p30_p10, %s29_s15), 0 }
  0x46   : > { %s104_s9 = ssub.s32 %s1508_s22, %s1929_s15  ;;  %s234_s11 = scalar_lea.vmem [#allocation8], %s1150_s17 }
  0x47   : > { %s1706_s8 = scalar_lea.hbm %s1898_s3, %s1126_s25  ;;  %s241_s26 = sshll.u32 %s234_s11, 4  ;;  %s1710_s26 = int_to_ptr.vmem [resolvable:$true] %s241_s26 }
  0x48   : > { %p105_p2 = scmp.eq.s32.totalorder %s104_s9, 0  ;;  %s1717_s13 = scalar_lea.sflag [#allocation4], %s230_s14 }
  0x49   : > { %s1392_s16 = scalar_lea.hbm %s1706_s8, 6144  ;;  %p1394_p9 = pneg %p1639_p4 }
  0x4a   : > { %s1715_s10 = scalar_select %p105_p2, %s1500_s20, %s1913_s30  }
  0x4b   : > { %p1393_p8 = scmp.ne.s32.totalorder %s1706_s8, %s1392_s16  ;;  %s1397_s17 = scalar_lea.hbm %s1898_s3, 12288 }
  0x4c   : > { %p1398_p5 = scmp.lt.u32.totalorder %s1706_s8, %s1898_s3  ;;  %p1399_p1 = scmp.lt.u32.totalorder %s1397_s17, %s1392_s16 }
  0x4d   : > { %p1395_p0 = pnand %p1394_p9, %p1393_p8  ;;  %p1401_p11 = scmp.lt.u32.totalorder %s1392_s16, %s1706_s8 }
  0x4e   : > { %p1400_p6 = por %p1399_p1, %p1398_p5 }
  0x4f   : > { %p1396_p13 = pneg %p1395_p0 }
  0x50   : > { %p1402_p3 = por %p1401_p11, %p1400_p6 }
  0x52   : > { %p1403_p7 = pnand %p1402_p3, %p1396_p13 }
  0x54   : > { %1406 = shalt.err (!%p1403_p7)
}
  0x55   : > { %s1407_s14 = scalar_lea.vmem %s1710_s26, 6144  ;;  %s1520_s11 = smov [#allocation8]  }
  0x56   : > { %p1408_p10 = scmp.ne.s32.totalorder %s1710_s26, %s1407_s14  ;;  %s1412_s30 = sshll.u32 %s1520_s11, 4  ;;  %s1413_s30 = int_to_ptr.vmem [resolvable:$false] %s1412_s30 }
  0x57   : > { %s1414_s25 = scalar_lea.vmem %s1413_s30, 12288  ;;  %p1415_p0 = scmp.lt.s32.totalorder %s1710_s26, %s1413_s30 }
  0x58   : > { %p1410_p2 = pnand %p1408_p10, %p1394_p9  ;;  %p1416_p5 = scmp.lt.s32.totalorder %s1414_s25, %s1407_s14 }
  0x5a   : > { %p1411_p8 = pneg %p1410_p2  ;;  %p1417_p1 = por %p1416_p5, %p1415_p0 }
  0x5c   : > { %p1418_p6 = pnand %p1417_p1, %p1411_p8 }
  0x5e   : > { %1421 = shalt.err (!%p1418_p6)
}
  0x5f   : > { %s1521_s16 = smov 384   ;;  %s1522_s27 = smov 192  }
  0x60   : > { %s1523_s17 = smov 12   ;;  %261 = sbr.rel (%p1621_p12) target bundleno = 666 (0x29a), region = 40 }
  0x61   : > { %1175 = dma.hbm_to_vmem [thread:$0]  (!%p1639_p4), %s1706_s8, 6144, %s1710_s26, %s1717_s13, %s1521_s16, %s1522_s27, %s1523_s17  }
  0x62   : > { %p1914_p9 = scmp.eq.s32.totalorder (!%p1621_p12), %s1590_s24, 0 }
  0x67   : > { %1475 = dma.done.wait (%p1914_p9), [#allocation4], 128   ;;  %p1915_p13 = pmov %p1914_p9 }
  0x68   : > { %p1916_p11 = pmov %p1914_p9 }
  0x69   : > { %1477 = vsyncadd (%p1915_p13), [#allocation4], 4294967168 }
  0x6a   : > { %1479 = dma.done.wait (%p1916_p11), [#allocation7], 2048   ;;  %p1917_p3 = pmov %p1914_p9 }
  0x6b   : > { %s271_s12 = sand.u32 1, %s1590_s24   ;;  %s1757_s8 = sand.u32 1, %s1496_s19  }
  0x6c   : > { %1481 = vsyncadd (%p1917_p3), [#allocation7], 4294965248  ;;  %s1151_s6 = smul.u32 384, %s1757_s8  ;;  %s272_s26 = scalar_lea.sflag [#allocation4], %s271_s12 }
  0x6d   : > { %p1918_p12 = scmp.ne.s32.totalorder %s1906_s28, 0 }
  0x6e   : > { %s1760_s13 = scalar_lea.vmem [#allocation8], %s1151_s6 }
  0x6f   : > { %1483 = dma.done.wait (%p1918_p12), %s272_s26, 6144  }
  0x70   : > { %1485 = vsyncadd (%p1918_p12), %s272_s26, 4294961152  ;;  %s1152_s7 = smul.u32 48, %s1757_s8  ;;  %p1057_p7 = scmp.ne.s32.totalorder %s1504_s21, 0 }
  0x71   : > { %s308_s9 = smul.u32 3, %s1504_s21  ;;  %v1247_v0 = vld [vmem:[#allocation6 + $0x4] ss:$8 sps:$4 sm:$0xff] (!%p1057_p7)   ;;  %v1249_v1 = vld [vmem:[#allocation6] ss:$8 sps:$4 sm:$0xff] (!%p1057_p7)   ;;  %v1524_v2 = vmov (!%p1057_p7), 0   ;;  %v340_v18 = vlaneseq (!%p1057_p7) }
  0x72   : > { %s1774_s30 = scalar_lea.vmem [#allocation9], %s1152_s7  ;;  %319 = sbr.rel (%p1057_p7) target bundleno = 368 (0x170), region = 56  ;;  %468 = vmatprep.mubr.bf16.mxu0 (!%p1057_p7), %v1524_v2  ;;  %436 = vmatprep.subr.bf16.mxu0 (!%p1057_p7), %v1247_v0  ;;  %v1250_v3 = vld [vmem:[#allocation6 + $0x14] ss:$8 sps:$4 sm:$0xff] (!%p1057_p7)   ;;  %v1252_v4 = vld [vmem:[#allocation6 + $0x10] ss:$8 sps:$4 sm:$0xff] (!%p1057_p7)  }
  0x73   : > { %p309_p4 = scmp.lt.s32.totalorder %s308_s9, 5  ;;  %437 = vmatpush1.bf16.msra.mxu0 (!%p1057_p7), %v1249_v1  ;;  %v1253_v5 = vld [vmem:[#allocation6 + $0x24] ss:$8 sps:$4 sm:$0xff] (!%p1057_p7)   ;;  %v1255_v6 = vld [vmem:[#allocation6 + $0x20] ss:$8 sps:$4 sm:$0xff] (!%p1057_p7)   ;;  %v1271_v17 = vld [vmem:[#allocation3] sm:$0xff] (!%p1057_p7)  }
  0x74   : > { %438 = vmatprep.subr.bf16.mxu0 (!%p1057_p7), %v1250_v3  ;;  %v1256_v7 = vld [vmem:[#allocation6 + $0x34] ss:$8 sps:$4 sm:$0xff] (!%p1057_p7)   ;;  %v1258_v8 = vld [vmem:[#allocation6 + $0x30] ss:$8 sps:$4 sm:$0xff] (!%p1057_p7)   ;;  %v1259_v9 = vld [vmem:[#allocation6 + $0x44] ss:$8 sps:$4 sm:$0xff] (!%p1057_p7)  }
  0x75   : > { %s1931_s9 = smov (!%p309_p4, %s308_s9), 5  ;;  %v1261_v10 = vld [vmem:[#allocation6 + $0x40] ss:$8 sps:$4 sm:$0xff] (!%p1057_p7)   ;;  %v1262_v11 = vld [vmem:[#allocation6 + $0x54] ss:$8 sps:$4 sm:$0xff] (!%p1057_p7)   ;;  %v341_v19 = vshrl.u32 (!%p1057_p7), %v340_v18, 7 }
  0x76   : > { %s311_s11 = scalar_lea.vmem %s1899_s4, %s1931_s9  ;;  %v1264_v12 = vld [vmem:[#allocation6 + $0x50] ss:$8 sps:$4 sm:$0xff] (!%p1057_p7)   ;;  %v1265_v13 = vld [vmem:[#allocation6 + $0x64] ss:$8 sps:$4 sm:$0xff] (!%p1057_p7)   ;;  %v1267_v14 = vld [vmem:[#allocation6 + $0x60] ss:$8 sps:$4 sm:$0xff] (!%p1057_p7)  }
  0x77   : > { %439 = vmatpush1.bf16.msra.mxu0 (!%p1057_p7), %v1252_v4  ;;  %v1268_v15 = vld [vmem:[#allocation6 + $0x74] ss:$8 sps:$4 sm:$0xff] (!%p1057_p7)   ;;  %v1270_v16 = vld [vmem:[#allocation6 + $0x70] ss:$8 sps:$4 sm:$0xff] (!%p1057_p7)   ;;  %v342_v20 = vsub.s32 (!%p1057_p7), 0, %v341_v19  ;;  %v346_v22 = vsub.s32 (!%p1057_p7), 1, %v341_v19 }
  0x78   : > { %440 = vmatprep.subr.bf16.mxu0 (!%p1057_p7), %v1253_v5  ;;  %v338_v21 = vld [vmem:[%s1897_s2] sm:$0x3] (!%p1057_p7) }
  0x79   : > { %v343_v23 = vrot.slane %v338_v21, %v342_v20  ;;  %v347_v24 = vrot.slane %v338_v21, %v346_v22 }
  0x7b   : > { %441 = vmatpush1.bf16.msra.mxu0 %v1255_v6 }
  0x7c   : > { %442 = vmatprep.subr.bf16.mxu0 %v1256_v7 }
  0x7f   : > { %443 = vmatpush1.bf16.msra.mxu0 %v1258_v8 }
  0x80   : > { %444 = vmatprep.subr.bf16.mxu0 %v1259_v9 }
  0x83   : > { %445 = vmatpush1.bf16.msra.mxu0 %v1261_v10 }
  0x84   : > { %446 = vmatprep.subr.bf16.mxu0 %v1262_v11 }
  0x87   : > { %447 = vmatpush1.bf16.msra.mxu0 %v1264_v12 }
  0x88   : > { %448 = vmatprep.subr.bf16.mxu0 %v1265_v13 }
  0x8b   : > { %449 = vmatpush1.bf16.msra.mxu0 %v1267_v14 }
  0x8c   : > { %450 = vmatprep.subr.bf16.mxu0 %v1268_v15 }
  0x8f   : > { %451 = vmatpush1.bf16.msra.mxu0 %v1270_v16 }
  0x92   : > { %469 = vmatmul.mubr.bf16.vlgmr.msra.gmra.mrb[0].mxu0 %v1271_v17 }
 0x165   : > { %v470_v25 = vpop.f32.mrb[0].mxu0 }
 0x166   : > { %v471_v26 = vadd.f32 %v470_v25, %v343_v23  ;;  %v472_v27 = vpop.f32.mrb[1].mxu0 }
 0x167   : > { %v473_v28 = vadd.f32 %v472_v27, %v347_v24  ;;  %v474_v29 = vpop.f32.mrb[2].mxu0 }
 0x168   : > { %v475_v30 = vadd.f32 %v474_v29, %v343_v23  ;;  %v476_v31 = vpop.f32.mrb[3].mxu0  ;;  %v479_v33 = vmax.f32 %v471_v26, 0.0 }
 0x169   : > { %v477_v32 = vadd.f32 %v476_v31, %v347_v24  ;;  %v480_v35 = vmax.f32 %v473_v28, 0.0 }
 0x16a   : > { %v481_v34 = vmax.f32 %v475_v30, 0.0 }
 0x16b   : > { %v482_v36 = vmax.f32 %v477_v32, 0.0 }
 0x16c   : > { %v483_v37 = vpack.c.bf16 %v481_v34, %v479_v33 }
 0x16d   : > { %v484_v38 = vpack.c.bf16 %v482_v36, %v480_v35 }
 0x16e   : > { %485 = vst [vmem:[#allocation2] sm:$0xff] %v483_v37 }
 0x16f   : > { %486 = vst [vmem:[#allocation2 + $0x8] sm:$0xff] %v484_v38 }
 0x170 PF: > { %v1272_v39 = vld [vmem:[%s1760_s13 + $0x4] ss:$12 sps:$4 sm:$0xff]   ;;  %v1274_v40 = vld [vmem:[%s1760_s13] ss:$12 sps:$4 sm:$0xff]   ;;  %v1275_v41 = vld [vmem:[%s1760_s13 + $0x1c] ss:$12 sps:$4 sm:$0xff]   ;;  %v555_v25 = vlaneseq }
 0x171   : > { %826 = vmatprep.subr.bf16.mxu0 %v1272_v39  ;;  %v1277_v42 = vld [vmem:[%s1760_s13 + $0x18] ss:$12 sps:$4 sm:$0xff]   ;;  %v1278_v43 = vld [vmem:[%s1760_s13 + $0x34] ss:$12 sps:$4 sm:$0xff]   ;;  %v1280_v44 = vld [vmem:[%s1760_s13 + $0x30] ss:$12 sps:$4 sm:$0xff]  }
 0x172   : > { %827 = vmatpush1.bf16.msra.mxu0 %v1274_v40  ;;  %v1281_v45 = vld [vmem:[%s1760_s13 + $0x4c] ss:$12 sps:$4 sm:$0xff]   ;;  %v1293_v46 = vld [vmem:[%s1760_s13 + $0xc8] ss:$12 sps:$4 sm:$0xff]   ;;  %v1284_v48 = vld [vmem:[%s1760_s13 + $0x64] ss:$12 sps:$4 sm:$0xff]  }
 0x173   : > { %828 = vmatprep.subr.bf16.mxu0 %v1275_v41  ;;  %v1283_v47 = vld [vmem:[%s1760_s13 + $0x48] ss:$12 sps:$4 sm:$0xff]   ;;  %1128 = vmatprep.subr.bf16.mxu1 %v1293_v46  ;;  %v1298_v50 = vld [vmem:[%s1760_s13 + $0xe0] ss:$12 sps:$4 sm:$0xff]   ;;  %v1303_v54 = vld [vmem:[%s1760_s13 + $0xf8] ss:$12 sps:$4 sm:$0xff]  }
 0x174   : > { %v1296_v49 = vld [vmem:[%s1760_s13 + $0x8] ss:$12 sps:$4 sm:$0xff]   ;;  %v1286_v51 = vld [vmem:[%s1760_s13 + $0x60] ss:$12 sps:$4 sm:$0xff]   ;;  %v1289_v55 = vld [vmem:[%s1760_s13 + $0x78] ss:$12 sps:$4 sm:$0xff]  }
 0x175   : > { %1129 = vmatpush3.bf16.msra.mxu1 %v1296_v49  ;;  %v1287_v52 = vld [vmem:[%s1760_s13 + $0x7c] ss:$12 sps:$4 sm:$0xff]   ;;  %v1301_v53 = vld [vmem:[%s1760_s13 + $0x20] ss:$12 sps:$4 sm:$0xff]   ;;  %v1306_v56 = vld [vmem:[%s1760_s13 + $0x38] ss:$12 sps:$4 sm:$0xff]  }
 0x176   : > { %829 = vmatpush1.bf16.msra.mxu0 %v1277_v42  ;;  %1130 = vmatprep.subr.bf16.mxu1 %v1298_v50  ;;  %v1290_v57 = vld [vmem:[%s1760_s13 + $0x94] ss:$12 sps:$4 sm:$0xff]   ;;  %v1308_v58 = vld [vmem:[%s1760_s13 + $0x110] ss:$12 sps:$4 sm:$0xff]   ;;  %v1294_v62 = vld [vmem:[%s1760_s13 + $0xac] ss:$12 sps:$4 sm:$0xff]  }
 0x177   : > { %830 = vmatprep.subr.bf16.mxu0 %v1278_v43  ;;  %v1292_v59 = vld [vmem:[%s1760_s13 + $0x90] ss:$12 sps:$4 sm:$0xff]   ;;  %v1313_v61 = vld [vmem:[%s1760_s13 + $0x128] ss:$12 sps:$4 sm:$0xff]   ;;  %v1318_v1 = vld [vmem:[%s1760_s13 + $0x140] ss:$12 sps:$4 sm:$0xff]  }
 0x178   : > { %v1311_v60 = vld [vmem:[%s1760_s13 + $0x50] ss:$12 sps:$4 sm:$0xff]   ;;  %v1297_v63 = vld [vmem:[%s1760_s13 + $0xa8] ss:$12 sps:$4 sm:$0xff]   ;;  %v1302_v3 = vld [vmem:[%s1760_s13 + $0xc0] ss:$12 sps:$4 sm:$0xff]  }
 0x179   : > { %1131 = vmatpush3.bf16.msra.mxu1 %v1301_v53  ;;  %v1316_v0 = vld [vmem:[%s1760_s13 + $0x68] ss:$12 sps:$4 sm:$0xff]   ;;  %v1299_v2 = vld [vmem:[%s1760_s13 + $0xc4] ss:$12 sps:$4 sm:$0xff]   ;;  %v1321_v4 = vld [vmem:[%s1760_s13 + $0x80] ss:$12 sps:$4 sm:$0xff]  }
 0x17a   : > { %831 = vmatpush1.bf16.msra.mxu0 %v1280_v44  ;;  %1132 = vmatprep.subr.bf16.mxu1 %v1303_v54  ;;  %v1323_v5 = vld [vmem:[%s1760_s13 + $0x158] ss:$12 sps:$4 sm:$0xff]   ;;  %v1304_v6 = vld [vmem:[%s1760_s13 + $0xdc] ss:$12 sps:$4 sm:$0xff]   ;;  %v1309_v10 = vld [vmem:[%s1760_s13 + $0xf4] ss:$12 sps:$4 sm:$0xff]  }
 0x17b   : > { %832 = vmatprep.subr.bf16.mxu0 %v1281_v45  ;;  %v1326_v7 = vld [vmem:[%s1760_s13 + $0x98] ss:$12 sps:$4 sm:$0xff]   ;;  %v1328_v9 = vld [vmem:[%s1760_s13 + $0x170] ss:$12 sps:$4 sm:$0xff]   ;;  %v487_v15 = vld [vmem:[#allocation2] sm:$0xff]  ;;  %v556_v26 = vshrl.u32 %v555_v25, 7 }
 0x17c   : > { %v1307_v8 = vld [vmem:[%s1760_s13 + $0xd8] ss:$12 sps:$4 sm:$0xff]   ;;  %v488_v11 = vld [vmem:[#allocation2 + $0x8] sm:$0xff]  ;;  %v1322_v18 = vld [vmem:[%s1760_s13 + $0x120] ss:$12 sps:$4 sm:$0xff]   ;;  %s1127_s17 = smul.u32 384, %s1504_s21 }
 0x17d   : > { %1133 = vmatpush3.bf16.msra.mxu1 %v1306_v56  ;;  %901 = vmatprep.mubr.bf16.mxu1 %v488_v11  ;;  %v1331_v12 = vld [vmem:[%s1760_s13 + $0xb0] ss:$12 sps:$4 sm:$0xff]   ;;  %v1314_v14 = vld [vmem:[%s1760_s13 + $0x10c] ss:$12 sps:$4 sm:$0xff]   ;;  %v1317_v16 = vld [vmem:[%s1760_s13 + $0x108] ss:$12 sps:$4 sm:$0xff]  }
 0x17e   : > { %833 = vmatpush1.bf16.msra.mxu0 %v1283_v47  ;;  %1134 = vmatprep.subr.bf16.mxu1 %v1308_v58  ;;  %v1312_v13 = vld [vmem:[%s1760_s13 + $0xf0] ss:$12 sps:$4 sm:$0xff]   ;;  %v1327_v20 = vld [vmem:[%s1760_s13 + $0x138] ss:$12 sps:$4 sm:$0xff]   ;;  %v1329_v21 = vld [vmem:[%s1760_s13 + $0x154] ss:$12 sps:$4 sm:$0xff]  }
 0x17f   : > { %834 = vmatprep.subr.bf16.mxu0 %v1284_v48  ;;  %858 = vmatprep.mubr.bf16.mxu0 %v488_v11  ;;  %v1319_v17 = vld [vmem:[%s1760_s13 + $0x124] ss:$12 sps:$4 sm:$0xff]   ;;  %v1324_v19 = vld [vmem:[%s1760_s13 + $0x13c] ss:$12 sps:$4 sm:$0xff]   ;;  %v1333_v23 = vld [vmem:[%s1760_s13 + $0x16c] ss:$12 sps:$4 sm:$0xff]  }
 0x180   : > { %v1332_v22 = vld [vmem:[%s1760_s13 + $0x150] ss:$12 sps:$4 sm:$0xff]   ;;  %v1335_v24 = vld [vmem:[%s1760_s13 + $0x168] ss:$12 sps:$4 sm:$0xff]   ;;  %v565_v27 = vsub.s32 2, %v556_v26  ;;  %v557_v38 = vsub.s32 0, %v556_v26  ;;  %s1840_s13 = scalar_lea.hbm %s1900_s5, %s1127_s17 }
 0x181   : > { %1135 = vmatpush3.bf16.msra.mxu1 %v1311_v60  ;;  %v553_v28 = vld [vmem:[%s311_s11] sm:$0x7]  ;;  %v561_v39 = vsub.s32 1, %v556_v26  ;;  %s933_s12 = sshll.u32 %s1774_s30, 4  ;;  %s917_s21 = scalar_lea.sflag [#allocation5], %s1757_s8  ;;  %s1843_s12 = int_to_ptr.vmem [resolvable:$true] %s933_s12 }
 0x182   : > { %835 = vmatpush1.bf16.msra.mxu0 %v1286_v51  ;;  %1136 = vmatprep.subr.bf16.mxu1 %v1313_v61  ;;  %v566_v30 = vrot.slane %v553_v28, %v565_v27  ;;  %v558_v40 = vrot.slane %v553_v28, %v557_v38  ;;  %s1422_s7 = scalar_lea.vmem %s1843_s12, 768  ;;  %p1919_p2 = scmp.ne.s32.totalorder %s1907_s29, 0 }
 0x183   : > { %836 = vmatprep.subr.bf16.mxu0 %v1287_v52  ;;  %v562_v41 = vrot.slane %v553_v28, %v561_v39  ;;  %p1423_p10 = scmp.ne.s32.totalorder %s1843_s12, %s1422_s7  ;;  %s1525_s9 = smov [#allocation9]  }
 0x184   : > { %s1426_s24 = sshll.u32 %s1525_s9, 4  ;;  %s1427_s24 = int_to_ptr.vmem [resolvable:$false] %s1426_s24 }
 0x185   : > { %1137 = vmatpush3.bf16.msra.mxu1 %v1316_v0  ;;  %p1424_p8 = pnand %p1423_p10, %p1919_p2  ;;  %s1428_s14 = scalar_lea.vmem %s1427_s24, 1536 }
 0x186   : > { %837 = vmatpush1.bf16.msra.mxu0 %v1289_v55  ;;  %1138 = vmatprep.subr.bf16.mxu1 %v1318_v1  ;;  %p1429_p5 = scmp.lt.s32.totalorder %s1843_s12, %s1427_s24  ;;  %p1430_p1 = scmp.lt.s32.totalorder %s1428_s14, %s1422_s7 }
 0x187   : > { %838 = vmatprep.subr.bf16.mxu0 %v1290_v57  ;;  %p1425_p0 = pneg %p1424_p8 }
 0x188   : > { %p1431_p6 = por %p1430_p1, %p1429_p5 }
 0x189   : > { %1139 = vmatpush3.bf16.msra.mxu1 %v1321_v4 }
 0x18a   : > { %839 = vmatpush1.bf16.msra.mxu0 %v1292_v59  ;;  %1140 = vmatprep.subr.bf16.mxu1 %v1323_v5  ;;  %p1432_p9 = pnand %p1431_p6, %p1425_p0 }
 0x18b   : > { %840 = vmatprep.subr.bf16.mxu0 %v1294_v62 }
 0x18d   : > { %1141 = vmatpush3.bf16.msra.mxu1 %v1326_v7 }
 0x18e   : > { %841 = vmatpush1.bf16.msra.mxu0 %v1297_v63  ;;  %1142 = vmatprep.subr.bf16.mxu1 %v1328_v9 }
 0x18f   : > { %842 = vmatprep.subr.bf16.mxu0 %v1299_v2 }
 0x191   : > { %1143 = vmatpush3.bf16.msra.mxu1 %v1331_v12 }
 0x192   : > { %843 = vmatpush1.bf16.msra.mxu0 %v1302_v3 }
 0x193   : > { %844 = vmatprep.subr.bf16.mxu0 %v1304_v6 }
 0x194   : > { %902 = vmatmul.mubr.bf16.vlgmr.msra.gmra.mrb[0].mxu1 %v487_v15 }
 0x196   : > { %845 = vmatpush1.bf16.msra.mxu0 %v1307_v8 }
 0x197   : > { %846 = vmatprep.subr.bf16.mxu0 %v1309_v10 }
 0x19a   : > { %847 = vmatpush1.bf16.msra.mxu0 %v1312_v13 }
 0x19b   : > { %848 = vmatprep.subr.bf16.mxu0 %v1314_v14 }
 0x19e   : > { %849 = vmatpush1.bf16.msra.mxu0 %v1317_v16 }
 0x19f   : > { %850 = vmatprep.subr.bf16.mxu0 %v1319_v17 }
 0x1a2   : > { %851 = vmatpush1.bf16.msra.mxu0 %v1322_v18 }
 0x1a3   : > { %852 = vmatprep.subr.bf16.mxu0 %v1324_v19 }
 0x1a6   : > { %853 = vmatpush1.bf16.msra.mxu0 %v1327_v20 }
 0x1a7   : > { %854 = vmatprep.subr.bf16.mxu0 %v1329_v21 }
 0x1aa   : > { %855 = vmatpush1.bf16.msra.mxu0 %v1332_v22 }
 0x1ab   : > { %856 = vmatprep.subr.bf16.mxu0 %v1333_v23 }
 0x1ae   : > { %857 = vmatpush1.bf16.msra.mxu0 %v1335_v24 }
 0x1b1   : > { %859 = vmatmul.mubr.bf16.vlgmr.msra.gmra.mrb[0].mxu0 %v487_v15 }
 0x267   : > { %v1144_v29 = vpop.f32.mrb[0].mxu1 }
 0x268   : > { %v1145_v31 = vpop.f32.mrb[1].mxu1 }
 0x269   : > { %v1146_v32 = vadd.f32 %v1145_v31, %v1144_v29  ;;  %v1147_v33 = vpop.f32.mrb[2].mxu1 }
 0x26a   : > { %v1148_v34 = vpop.f32.mrb[3].mxu1 }
 0x26b   : > { %v904_v35 = vadd.f32 %v1146_v32, %v566_v30  ;;  %v1149_v36 = vadd.f32 %v1148_v34, %v1147_v33 }
 0x26d   : > { %912 = vst [vmem:[%s1774_s30 + $0x10] sm:$0xff] %v904_v35  ;;  %v907_v37 = vadd.f32 %v1149_v36, %v566_v30 }
 0x26f   : > { %915 = vst [vmem:[%s1774_s30 + $0x28] sm:$0xff] %v907_v37 }
 0x284   : > { %v860_v42 = vpop.f32.mrb[0].mxu0 }
 0x285   : > { %v861_v43 = vadd.f32 %v860_v42, %v558_v40  ;;  %v862_v44 = vpop.f32.mrb[1].mxu0 }
 0x286   : > { %v863_v45 = vadd.f32 %v862_v44, %v562_v41  ;;  %v864_v46 = vpop.f32.mrb[2].mxu0 }
 0x287   : > { %910 = vst [vmem:[%s1774_s30] sm:$0xff] %v861_v43  ;;  %v865_v47 = vadd.f32 %v864_v46, %v558_v40  ;;  %v866_v48 = vpop.f32.mrb[3].mxu0 }
 0x288   : > { %911 = vst [vmem:[%s1774_s30 + $0x8] sm:$0xff] %v863_v45  ;;  %v867_v49 = vadd.f32 %v866_v48, %v562_v41 }
 0x289   : > { %913 = vst [vmem:[%s1774_s30 + $0x18] sm:$0xff] %v865_v47 }
 0x28a   : > { %914 = vst [vmem:[%s1774_s30 + $0x20] sm:$0xff] %v867_v49 }
 0x28b   : > { %1435 = shalt.err (!%p1432_p9)
}
 0x28c   : > { %s1436_s11 = scalar_lea.hbm %s1840_s13, 768  ;;  %s1440_s25 = scalar_lea.hbm %s1900_s5, 1536 }
 0x28d   : > { %p1437_p13 = scmp.ne.s32.totalorder %s1840_s13, %s1436_s11  ;;  %p1441_p12 = scmp.lt.u32.totalorder %s1840_s13, %s1900_s5 }
 0x28e   : > { %p1442_p4 = scmp.lt.u32.totalorder %s1440_s25, %s1436_s11  ;;  %p1444_p10 = scmp.lt.u32.totalorder %s1436_s11, %s1840_s13 }
 0x28f   : > { %p1438_p11 = pnand %p1437_p13, %p1919_p2 }
 0x290   : > { %p1443_p7 = por %p1442_p4, %p1441_p12 }
 0x291   : > { %p1439_p3 = pneg %p1438_p11 }
 0x292   : > { %p1445_p8 = por %p1444_p10, %p1443_p7 }
 0x294   : > { %p1446_p0 = pnand %p1445_p8, %p1439_p3 }
 0x296   : > { %1449 = shalt.err (!%p1446_p0)
}
 0x297   : > { %s1526_s17 = smov 384   ;;  %s1527_s6 = smov 768  }
 0x298   : > { %s1528_s26 = smov 24  }
 0x299   : > { %1163 = dma.vmem_to_hbm [thread:$0]  (%p1919_p2), %s1843_s12, 768, %s1840_s13, %s917_s21, %s1526_s17, %s1527_s6, %s1528_s26  }
 0x29a PF: > { %s1920_s7 = sld [smem:[#allocation14_spill]]  ;;  %s948_s9 = sand.u32 1, %s1492_s18  }
 0x29b   : > { %p1922_p1 = scmp.ge.s32.totalorder %s1512_s23, 2  ;;  %s949_s24 = scalar_lea.sflag [#allocation5], %s948_s9 }
 0x2a0   : > { %p1921_p5 = scmp.ne.s32.totalorder %s1920_s7, 0 }
 0x2a2   : > { %p1177_p6 = pnand %p1922_p1, %p1921_p5 }
 0x2a4   : > { %1487 = dma.done.wait (!%p1177_p6), %s949_s24, 768  }
 0x2a5   : > { %1489 = vsyncadd (!%p1177_p6), %s949_s24, 4294966528  ;;  %s20_s23 = sadd.s32 1, %s1512_s23   ;;  %s1923_s18 = smov %s1496_s19 }
 0x2a6   : > { %p17_p9 = scmp.ge.s32.totalorder %s20_s23, 4   ;;  %s1924_s19 = smov %s1500_s20 }
 0x2a7   : > { %s1925_s20 = smov %s1715_s10  ;;  %s1926_s21 = smov %s1508_s22 }
 0x2a8   : > { %s1927_s22 = smov %s1929_s15  ;;  %19 = sbr.rel (!%p17_p9) target bundleno = 6 (0x6), region = 100 }
 0x2af   :  { %954 = vsyncpa [#allocation4], 1 }
 0x2b0   :  { %956 = vsyncpa [#allocation4 + $0x1], 1 }
 0x2b1   :  { %957 = vsyncpa [#allocation7], 1 }
 0x2b2   :  { %958 = vsyncpa [#allocation5], 1 }
 0x2b3   :  { %960 = vsyncpa [#allocation5 + $0x1], 1 }

</bundles_post_ra>
